<compile_context>
chip_gen: v5e
topology: v5e:2x2
jax: 0.10.0
libtpu: 0.0.40
codegen_flags: <defaults>
</compile_context>

<pallas_src>
import jax
import jax.numpy as jnp
from jax.experimental import pallas as pl
from jax.experimental.pallas import tpu as pltpu


def _patch_embed_kernel(xp_ref, w_ref, bp_ref, o_ref):
    # xp: [tile_n, K_pad] bf16, w: [K_pad, D_pad] bf16 (VMEM-resident),
    # bp: [tile_n, D_pad] bf16 (bias + pos (+ cls on row 0), revisited block),
    # o : [tile_n, D_pad] out_dtype.
    proj = jnp.dot(xp_ref[...], w_ref[...], preferred_element_type=jnp.float32)
    o_ref[...] = (proj + bp_ref[...].astype(jnp.float32)).astype(o_ref.dtype)


def extract_patches(x, patch_size):
    """Match torch unfold(2,P,P).unfold(3,P,P).permute(0,2,3,1,4,5).view(B,-1,C*P*P)."""
    B, C, H, W = x.shape
    P = patch_size
    nH, nW = H // P, W // P
    x = x.reshape(B, C, nH, P, nW, P)
    x = jnp.transpose(x, (0, 2, 4, 1, 3, 5))      # [B, nH, nW, C, P, P]
    return x.reshape(B, nH * nW, C * P * P)       # [B, N, K]


def _round_up(x, m):
    return ((x + m - 1) // m) * m


def _pick_row_tile(n_total, target):
    """Largest multiple of 128 that divides n_total (itself a multiple of 128)
    and is <= target."""
    best = 128
    t = 128
    while t <= min(target, n_total):
        if n_total % t == 0:
            best = t
        t += 128
    return best


def patch_embedding_forward(x, w, b, cls_token, pos_enc, patch_size, *,
                            compute_dtype=jnp.bfloat16, out_dtype=None,
                            tile_n_target=512):
    """x: [B, C, H, W] (NCHW, like PyTorch). Returns [B, N+1, D]."""
    B, C, H, W = x.shape
    P = patch_size
    N = (H // P) * (W // P)
    K = C * P * P
    D = w.shape[1]
    if out_dtype is None:
        out_dtype = compute_dtype

    # Cast to the compute dtype BEFORE the patch transpose so the materialized
    # x_patches costs 2 B/elem of HBM traffic instead of 4 (XLA fuses the
    # convert + transpose + pad below into one pass).
    x_patches = extract_patches(x.astype(compute_dtype), P)       # [B, N, K]

    # --- padding / tiling (128-aligned rows, lanes) ---
    K_pad = _round_up(K, 128)
    D_pad = _round_up(D, 128)
    N_rows = N + 1                          # +1: cls row folded into the matmul
    N_total = _round_up(N_rows, 128)
    tile_n = _pick_row_tile(N_total, tile_n_target)

    # Augmented patch matrix: one leading all-zero row per batch element stands
    # in for the cls token (0 @ W + (cls + pos_0) = cls row); trailing rows and
    # K columns are zero padding (contribute nothing to the matmul).
    xp_aug = jnp.pad(x_patches, ((0, 0), (1, N_total - N - 1), (0, K_pad - K)))

    # Weights: bf16, zero-padded K/D.
    w_c = jnp.pad(w.astype(compute_dtype), ((0, K_pad - K), (0, D_pad - D)))

    # Bias + position encoding (+ cls token on row 0): precombined in f32,
    # stored bf16 (upcast again in-kernel for the f32 epilogue add).
    bp_rows = jnp.concatenate(
        [cls_token[0] + pos_enc[0, :1, :],              # row 0: cls + pos_0
         b[None, :] + pos_enc[0, 1:, :]], axis=0)       # rows 1..N
    bp = jnp.pad(bp_rows.astype(compute_dtype),
                 ((0, N_total - N_rows), (0, D_pad - D)))

    # Batch innermost: bp block index (ni, 0) and the weight block (0, 0) are
    # unchanged across consecutive steps -> Pallas skips their re-DMA.
    grid = (N_total // tile_n, B)

    out_bytes = jnp.dtype(out_dtype).itemsize
    vmem_needed = (2 * tile_n * K_pad * 2          # xp, double buffered, bf16
                   + 2 * K_pad * D_pad * 2         # weights (2 bufs allocated)
                   + 2 * tile_n * D_pad * 2        # bias+pos, bf16
                   + 2 * tile_n * D_pad * out_bytes)   # output
    vmem_limit = int(min(max(2 * vmem_needed + (4 << 20), 32 << 20), 64 << 20))

    cost = pl.CostEstimate(
        flops=2 * B * N_total * K_pad * D_pad,
        transcendentals=0,
        bytes_accessed=(B * N_total * K_pad * 2    # patches read
                        + K_pad * D_pad * 2        # weights read once
                        + N_total * D_pad * 2      # bias+pos read once
                        + B * N_total * D_pad * out_bytes))  # output write

    out_full = pl.pallas_call(
        _patch_embed_kernel,
        out_shape=jax.ShapeDtypeStruct((B, N_total, D_pad), out_dtype),
        grid=grid,
        in_specs=[
            # Row tile of patches; batch dim squeezed -> kernel sees [tile_n, K_pad].
            pl.BlockSpec((pl.Squeezed(), tile_n, K_pad),
                         lambda ni, bi: (bi, ni, 0)),
            # Weights: constant block index -> VMEM-resident, no re-DMA.
            pl.BlockSpec((K_pad, D_pad), lambda ni, bi: (0, 0)),
            # Bias+pos: index depends only on the outer axis -> revisited block,
            # fetched once per row tile (not once per batch element).
            pl.BlockSpec((tile_n, D_pad), lambda ni, bi: (ni, 0)),
        ],
        out_specs=pl.BlockSpec((pl.Squeezed(), tile_n, D_pad),
                               lambda ni, bi: (bi, ni, 0)),
        compiler_params=pltpu.CompilerParams(
            dimension_semantics=("parallel", "parallel"),
            vmem_limit_bytes=vmem_limit),
        cost_estimate=cost,
    )(xp_aug, w_c, bp)

    # Slice off zero padding (no-op when N+1 and D are already 128-aligned).
    if N_total == N_rows and D_pad == D:
        return out_full
    return out_full[:, :N_rows, :D]


if __name__ == "__main__":
    # Small config consistent with the module: C is hardcoded to 3 by the Linear.
    patch_size = 4
    image_size = 16
    d_model = 32
    B, C, H, W = 2, 3, image_size, image_size
    N = (image_size // patch_size) ** 2           # 16
    K = patch_size * patch_size * 3               # 48

    key = jax.random.PRNGKey(0)
    kx, kw, kb, kc, kp = jax.random.split(key, 5)

    x = jax.random.normal(kx, (B, C, H, W), dtype=jnp.float32)
    # nn.Linear(K, d_model): weight [d_model, K]; we store transposed [K, d_model].
    w = jax.random.normal(kw, (K, d_model), dtype=jnp.float32) * 0.02
    b = jax.random.normal(kb, (d_model,), dtype=jnp.float32) * 0.02
    cls_token = jax.random.normal(kc, (1, 1, d_model), dtype=jnp.float32)
    pos_enc = jax.random.normal(kp, (1, N + 1, d_model), dtype=jnp.float32)

    out = patch_embedding_forward(x, w, b, cls_token, pos_enc, patch_size)
    out = jax.block_until_ready(out)

    # Reference in plain JAX / f32. Kernel uses bf16 operands + bf16 output
    # container (f32 accumulation), so tolerance is loosened accordingly.
    xp = extract_patches(x, patch_size)
    ref = (jnp.einsum("bnk,kd->bnd", xp, w,
                      precision=jax.lax.Precision.HIGHEST)
           + b[None, None, :] + pos_enc[:, 1:, :])
    ref = jnp.concatenate(
        [jnp.broadcast_to(cls_token + pos_enc[:, :1, :], (B, 1, d_model)), ref],
        axis=1,
    )
    assert out.shape == (B, N + 1, d_model)
    assert jnp.allclose(out.astype(jnp.float32), ref, atol=5e-2, rtol=5e-2)

    print("KERNEL_OK")
</pallas_src>

<mosaic_0001>
module attributes {stable_mosaic.version = 11 : i64} {
  func.func @_patch_embed_kernel(%arg0: i32, %arg1: i32, %arg2: memref<1x128x128xbf16, #tpu.memory_space<vmem>>, %arg3: memref<128x128xbf16, #tpu.memory_space<vmem>>, %arg4: memref<128x128xbf16, #tpu.memory_space<vmem>>, %arg5: memref<1x128x128xbf16, #tpu.memory_space<vmem>>) attributes {dimension_semantics = [#tpu.dimension_semantics<parallel>, #tpu.dimension_semantics<parallel>], iteration_bounds = array<i64: 1, 2>, scalar_prefetch = 0 : i64, scratch_operands = 0 : i64, tpu.core_type = #tpu.core_type<tc>, window_params = [{transform_indices = @transform_0, window_bounds = array<i64: 1, 128, 128>}, {pipeline_mode = #tpu.pipeline_mode<synchronous>, transform_indices = @transform_1, window_bounds = array<i64: 128, 128>}, {transform_indices = @transform_2, window_bounds = array<i64: 128, 128>}, {transform_indices = @transform_3, window_bounds = array<i64: 1, 128, 128>}]} {
    %c0 = arith.constant 0 : index
    %c0_0 = arith.constant 0 : index
    %c0_1 = arith.constant 0 : index
    %0 = vector.load %arg2[%c0, %c0_0, %c0_1] : memref<1x128x128xbf16, #tpu.memory_space<vmem>>, vector<1x128x128xbf16>
    %1 = vector.shape_cast %0 : vector<1x128x128xbf16> to vector<128x128xbf16>
    %c0_2 = arith.constant 0 : index
    %c0_3 = arith.constant 0 : index
    %2 = vector.load %arg3[%c0_2, %c0_3] : memref<128x128xbf16, #tpu.memory_space<vmem>>, vector<128x128xbf16>
    %cst = arith.constant dense<0.000000e+00> : vector<128x128xf32>
    %3 = tpu.matmul %1, %2, %cst {dimension_numbers = #tpu.dot_dimension_numbers<[1], [0], [0], [1], [0, 0, 1, 1], [], []>} : vector<128x128xbf16>, vector<128x128xbf16>, vector<128x128xf32> -> vector<128x128xf32>
    %c0_4 = arith.constant 0 : index
    %c0_5 = arith.constant 0 : index
    %4 = vector.load %arg4[%c0_4, %c0_5] : memref<128x128xbf16, #tpu.memory_space<vmem>>, vector<128x128xbf16>
    %5 = arith.extf %4 : vector<128x128xbf16> to vector<128x128xf32>
    %6 = arith.addf %3, %5 : vector<128x128xf32>
    %7 = arith.truncf %6 : vector<128x128xf32> to vector<128x128xbf16>
    %c0_6 = arith.constant 0 : index
    %c0_7 = arith.constant 0 : index
    %c0_8 = arith.constant 0 : index
    %8 = vector.load %arg5[%c0_6, %c0_7, %c0_8] : memref<1x128x128xbf16, #tpu.memory_space<vmem>>, vector<1x128x128xbf16>
    %9 = vector.shape_cast %8 : vector<1x128x128xbf16> to vector<128x128xbf16>
    %10 = vector.shape_cast %7 : vector<128x128xbf16> to vector<1x128x128xbf16>
    tpu.vector_store %arg5[%c0_6, %c0_7, %c0_8], %10 {strides = array<i32>} : memref<1x128x128xbf16, #tpu.memory_space<vmem>>, vector<1x128x128xbf16>,
    return
  }
  func.func @transform_0(%arg0: i32, %arg1: i32) -> (i32, i32, i32) {
    %c0_i32 = arith.constant 0 : i32
    %c0_i32_0 = arith.constant 0 : i32
    return %arg1, %arg0, %c0_i32 : i32, i32, i32
  }
  func.func @transform_1(%arg0: i32, %arg1: i32) -> (i32, i32) {
    %c0_i32 = arith.constant 0 : i32
    %c0_i32_0 = arith.constant 0 : i32
    %c0_i32_1 = arith.constant 0 : i32
    return %c0_i32, %c0_i32_0 : i32, i32
  }
  func.func @transform_2(%arg0: i32, %arg1: i32) -> (i32, i32) {
    %c0_i32 = arith.constant 0 : i32
    %c0_i32_0 = arith.constant 0 : i32
    return %arg0, %c0_i32 : i32, i32
  }
  func.func @transform_3(%arg0: i32, %arg1: i32) -> (i32, i32, i32) {
    %c0_i32 = arith.constant 0 : i32
    %c0_i32_0 = arith.constant 0 : i32
    return %arg1, %arg0, %c0_i32 : i32, i32, i32
  }
}

</mosaic_0001>

<bundles_post_ra>
// kernel: tpu_custom_call.1
= control target key start
LH: loop header
LB: loop body
LE: loop exit
PB: predicated region body
PF: predicated region fallthrough
CT: control target
= control target key end

     0   :  { %8 = vsyncpa [#allocation3], 0  ;;  %s1302_s0 = inlined_call_operand.hbm [shape: bf16[2,128,128], index: 0, kind: input, shape index: {}]   ;;  %s1303_s1 = inlined_call_operand.hbm [shape: bf16[128,128], index: 1, kind: input, shape index: {}]   ;;  %s1304_s2 = inlined_call_operand.hbm [shape: bf16[128,128], index: 2, kind: input, shape index: {}]   ;;  %s1305_s3 = inlined_call_operand.hbm [shape: bf16[2,128,128], index: 3, kind: output, shape index: {}]  }
   0x1   :  { %10 = vsyncpa [#allocation3 + $0x1], 0 }
   0x2   :  { %11 = vsyncpa [#allocation6], 0 }
   0x3   :  { %12 = vsyncpa [#allocation4], 0 }
   0x4   :  { %14 = vsyncpa [#allocation4 + $0x1], 0  ;;  %s1122_s12 = smov 0   ;;  %s1124_s13 = smov 0  }
   0x5   :  { %s1126_s14 = smov 0   ;;  %s1128_s15 = smov 0  }
   0x6   :  { %s1130_s16 = smov 0   ;;  %s1132_s17 = smov 0  }
   0x7 LB: > { %s620_s18 = sadd.s32 4294967295, %s1094_s17   ;;  %s621_s19 = sadd.s32 4294967294, %s1094_s17   ;;  %s1094_s17 = sphi %s1132_s17, %s20_s17   ;;  %s1090_s16 = sphi %s1130_s16, %s1315_s16   ;;  %s1086_s15 = sphi %s1128_s15, %s1314_s15   ;;  %s1082_s14 = sphi %s1126_s14, %s1313_s14   ;;  %s1078_s13 = sphi %s1124_s13, %s1312_s13   ;;  %s1074_s12 = sphi %s1122_s12, %s1311_s12  }
   0x8   : > { %p54_p0 = scmp.ne.s32.totalorder %s1078_s13, %s1074_s12  ;;  %p1158_p1 = scmp.eq.s32.totalorder %s620_s18, 0 }
   0x9   : > { %p133_p2 = scmp.eq.s32.totalorder %s621_s19, 1  ;;  %p622_p4 = scmp.ge.s32.totalorder %s1094_s17, 1 }
   0xa   : > { %p1164_p3 = por %p1158_p1, %p54_p0  ;;  %p140_p6 = scmp.lt.s32.totalorder %s1094_s17, 3 }
   0xb   : > { %p1169_p5 = por %p133_p2, %p54_p0  ;;  %s151_s25 = sshll.u32 %s1303_s1, 4  ;;  %s152_s25 = int_to_ptr.hbm [resolvable:$true] %s151_s25 }
   0xc   : > { %p1177_p7 = pnand %p622_p4, %p140_p6  ;;  %s1096_s27 = smov [#allocation5]  }
   0xd   : > { %s153_s28 = sshll.u32 %s1096_s27, 4  ;;  %p625_p10 = scmp.ge.s32.totalorder %s1094_s17, 2  ;;  %s154_s28 = int_to_ptr.vmem [resolvable:$true] %s153_s28 }
   0xe   : > { %p843_p8 = pneg %p1177_p7  ;;  %s168_s4 = sshll.u32 %s1304_s2, 4  ;;  %s169_s4 = int_to_ptr.hbm [resolvable:$true] %s168_s4 }
   0xf   : > { %s1097_s5 = smov 64   ;;  %s1098_s6 = smov 4  }
  0x10   : > { %p844_p9 = pnand %p843_p8, %p1158_p1  ;;  %s1099_s7 = smov [#allocation7]  }
  0x11   : > { %s170_s8 = sshll.u32 %s1099_s7, 4  ;;  %p127_p11 = scmp.eq.s32.totalorder %s620_s18, 1  ;;  %s171_s8 = int_to_ptr.vmem [resolvable:$true] %s170_s8 }
  0x12   : > { %846 = dma.hbm_to_vmem [thread:$0]  (!%p844_p9), %s152_s25, 1024, %s154_s28, [#allocation6], %s1097_s5, %s1097_s5, %s1098_s6  }
  0x13   : > { %849 = dma.hbm_to_vmem [thread:$0]  (!%p844_p9), %s169_s4, 1024, %s171_s8, [#allocation6], %s1097_s5, %s1097_s5, %s1098_s6  }
  0x14   : > { %s29_s9 = sadd.s32 1, %s1090_s16  ;;  %s41_s10 = sadd.s32 1, %s1082_s14 }
  0x15   : > { %p30_p12 = scmp.ge.s32.totalorder %s29_s9, 2  ;;  %p48_p13 = scmp.ne.s32.totalorder %s1082_s14, %s1078_s13 }
  0x16   : > { %p49_p0 = scmp.eq.s32.totalorder %s1094_s17, 0  ;;  %p860_p4 = scmp.lt.s32.totalorder %s1094_s17, 2 }
  0x17   : > { %s1317_s9 = smov (%p30_p12, %s29_s9), 0  ;;  %p1204_p2 = por %p127_p11, %p48_p13 }
  0x18   : > { %s36_s19 = ssub.s32 %s1090_s16, %s1317_s9  ;;  %s184_s23 = sand.u32 1, %s1082_s14  }
  0x19   : > { %p39_p6 = scmp.eq.s32.totalorder %s36_s19, 0  ;;  %p50_p8 = por %p49_p0, %p48_p13 }
  0x1a   : > { %s626_s24 = sshll.u32 %s184_s23, 6  ;;  %s703_s18 = sshll.u32 %s1090_s16, 6 }
  0x1b   : > { %s1214_s25 = scalar_select %p39_p6, %s1082_s14, %s41_s10  }
  0x1c   : > { %s195_s29 = scalar_lea.hbm %s1302_s0, %s703_s18  ;;  %s188_s4 = scalar_lea.vmem [#allocation2], %s626_s24 }
  0x1d   : > { %s196_s30 = sshll.u32 %s195_s29, 4  ;;  %s198_s7 = sshll.u32 %s188_s4, 4  ;;  %s197_s30 = int_to_ptr.hbm [resolvable:$true] %s196_s30  ;;  %s199_s7 = int_to_ptr.vmem [resolvable:$true] %s198_s7 }
  0x1e   : > { %p851_p9 = pnand %p860_p4, %p50_p8  ;;  %s185_s8 = scalar_lea.sflag [#allocation3], %s184_s23 }
  0x1f   : > { %210 = sbr.rel (%p1177_p7) target bundleno = 237 (0xed), region = 32  ;;  %s1227_s10 = sand.u32 (!%p1177_p7), 1, %s1078_s13  }
  0x20   : > { %853 = dma.hbm_to_vmem [thread:$0]  (!%p851_p9), %s197_s30, 1024, %s199_s7, %s185_s8, %s1097_s5, %s1097_s5, %s1098_s6  }
  0x21   : > { %s630_s19 = sshll.u32 (!%p1177_p7), %s1227_s10, 6  ;;  %s213_s24 = scalar_lea.sflag (!%p1177_p7), [#allocation3], %s1227_s10 }
  0x22   : > { %s1233_s18 = scalar_lea.vmem (!%p1177_p7), [#allocation2], %s630_s19 }
  0x24   : > { %1061 = dma.done.wait (%p1164_p3), %s213_s24, 1024  }
  0x25   : > { %1063 = vsyncadd (%p1164_p3), %s213_s24, 4294966272 }
  0x26   : > { %1065 = dma.done.wait (%p1158_p1), [#allocation6], 2048  }
  0x27   : > { %1067 = vsyncadd (%p1158_p1), [#allocation6], 4294965248  ;;  %v719_v0 = vld [vmem:[#allocation5 + $0x38] sm:$0xff]  ;;  %v718_v1 = vld [vmem:[#allocation5 + $0x30] sm:$0xff]  ;;  %s1253_s20 = scalar_lea.vmem [#allocation8], %s630_s19  ;;  %s720_s21 = sshll.u32 %s1086_s15, 6 }
  0x28   : > { %413 = vmatpush.bf16.msra.mxu0 %v719_v0  ;;  %807 = vmatpush.bf16.msra.mxu1 %v719_v0  ;;  %v717_v2 = vld [vmem:[#allocation5 + $0x28] sm:$0xff]  ;;  %v716_v3 = vld [vmem:[#allocation5 + $0x20] sm:$0xff]  ;;  %v715_v4 = vld [vmem:[#allocation5 + $0x18] sm:$0xff]  ;;  %s508_s6 = scalar_lea.hbm %s1305_s3, %s720_s21  ;;  %s509_s23 = sshll.u32 %s1253_s20, 4  ;;  %s510_s23 = int_to_ptr.vmem [resolvable:$true] %s509_s23 }
  0x29   : > { %808 = vmatpush.bf16.msra.mxu2 %v719_v0  ;;  %809 = vmatpush.bf16.msra.mxu3 %v719_v0  ;;  %v714_v5 = vld [vmem:[#allocation5 + $0x10] sm:$0xff]  ;;  %v713_v6 = vld [vmem:[#allocation5 + $0x8] sm:$0xff]  ;;  %v712_v7 = vld [vmem:[#allocation5] sm:$0xff]  ;;  %s511_s27 = sshll.u32 %s508_s6, 4  ;;  %s495_s15 = scalar_lea.sflag [#allocation4], %s1227_s10  ;;  %s512_s27 = int_to_ptr.hbm [resolvable:$true] %s511_s27 }
  0x2a   : > { %v704_v8 = vld [vmem:[%s1233_s18] sm:$0xff]  ;;  %v706_v9 = vld [vmem:[%s1233_s18 + $0x10] sm:$0xff]  ;;  %v705_v12 = vld [vmem:[%s1233_s18 + $0x8] sm:$0xff]  ;;  %s1022_s28 = sshra.s32 %s512_s27, 4  ;;  %s1028_s7 = scalar_lea.hbm %s1305_s3, 128  ;;  %s1023_s28 = int_to_ptr.hbm [resolvable:$true] %s1022_s28 }
  0x2b   : > { %v708_v10 = vld [vmem:[%s1233_s18 + $0x20] sm:$0xff]  ;;  %v710_v11 = vld [vmem:[%s1233_s18 + $0x30] sm:$0xff]  ;;  %v707_v13 = vld [vmem:[%s1233_s18 + $0x18] sm:$0xff]  ;;  %s1024_s29 = scalar_lea.hbm %s1023_s28, 64  ;;  %p1029_p11 = scmp.lt.s32.totalorder %s1023_s28, %s1305_s3 }
  0x2c   : > { %414 = vmatpush.bf16.msra.mxu0 %v718_v1  ;;  %810 = vmatpush.bf16.msra.mxu1 %v718_v1  ;;  %v709_v14 = vld [vmem:[%s1233_s18 + $0x28] sm:$0xff]  ;;  %v711_v15 = vld [vmem:[%s1233_s18 + $0x38] sm:$0xff]  ;;  %v722_v18 = vld [vmem:[#allocation7] sm:$0xff]   ;;  %p1025_p1 = scmp.ne.s32.totalorder %s1023_s28, %s1024_s29  ;;  %p1030_p12 = scmp.lt.s32.totalorder %s1028_s7, %s1024_s29 }
  0x2d   : > { %811 = vmatpush.bf16.msra.mxu2 %v718_v1  ;;  %812 = vmatpush.bf16.msra.mxu3 %v718_v1  ;;  %v794_v19 = vld [vmem:[#allocation7 + $0x10] sm:$0xff]   ;;  %v723_v20 = vunpack.c.l.bf16 %v722_v18  ;;  %v724_v22 = vunpack.c.h.bf16 %v722_v18  ;;  %v796_v30 = vld [vmem:[#allocation7 + $0x20] sm:$0xff]   ;;  %v793_v50 = vld [vmem:[#allocation7 + $0x8] sm:$0xff]  }
  0x2e   : > { %v731_v21 = vunpack.c.l.bf16 %v794_v19  ;;  %v732_v23 = vunpack.c.h.bf16 %v794_v19  ;;  %v798_v31 = vld [vmem:[#allocation7 + $0x30] sm:$0xff]   ;;  %v739_v36 = vunpack.c.l.bf16 %v796_v30  ;;  %v740_v38 = vunpack.c.h.bf16 %v796_v30  ;;  %v795_v51 = vld [vmem:[#allocation7 + $0x18] sm:$0xff]   ;;  %v797_v62 = vld [vmem:[#allocation7 + $0x28] sm:$0xff]   ;;  %p1026_p3 = pnand %p1025_p1, %p1204_p2  ;;  %p1031_p13 = por %p1030_p12, %p1029_p11 }
  0x2f   : > { %v747_v37 = vunpack.c.l.bf16 %v798_v31  ;;  %v748_v39 = vunpack.c.h.bf16 %v798_v31  ;;  %v727_v52 = vunpack.c.l.bf16 %v793_v50  ;;  %v735_v53 = vunpack.c.l.bf16 %v795_v51  ;;  %v799_v63 = vld [vmem:[#allocation7 + $0x38] sm:$0xff]  }
  0x30   : > { %415 = vmatpush.bf16.msra.mxu0 %v717_v2  ;;  %813 = vmatpush.bf16.msra.mxu1 %v717_v2  ;;  %v728_v54 = vunpack.c.h.bf16 %v793_v50  ;;  %v736_v55 = vunpack.c.h.bf16 %v795_v51  ;;  %p1027_p7 = pneg %p1026_p3 }
  0x31   : > { %814 = vmatpush.bf16.msra.mxu2 %v717_v2  ;;  %815 = vmatpush.bf16.msra.mxu3 %v717_v2 }
  0x32   : > { %p1032_p0 = pnand %p1031_p13, %p1027_p7 }
  0x34   : > { %416 = vmatpush.bf16.msra.mxu0 %v716_v3  ;;  %816 = vmatpush.bf16.msra.mxu1 %v716_v3 }
  0x35   : > { %817 = vmatpush.bf16.msra.mxu2 %v716_v3  ;;  %818 = vmatpush.bf16.msra.mxu3 %v716_v3 }
  0x38   : > { %417 = vmatpush.bf16.msra.mxu0 %v715_v4  ;;  %819 = vmatpush.bf16.msra.mxu1 %v715_v4 }
  0x39   : > { %820 = vmatpush.bf16.msra.mxu2 %v715_v4  ;;  %821 = vmatpush.bf16.msra.mxu3 %v715_v4  ;;  %v743_v4 = vunpack.c.l.bf16 %v797_v62 }
  0x3c   : > { %418 = vmatpush.bf16.msra.mxu0 %v714_v5  ;;  %822 = vmatpush.bf16.msra.mxu1 %v714_v5 }
  0x3d   : > { %823 = vmatpush.bf16.msra.mxu2 %v714_v5  ;;  %824 = vmatpush.bf16.msra.mxu3 %v714_v5  ;;  %v751_v5 = vunpack.c.l.bf16 %v799_v63 }
  0x40   : > { %419 = vmatpush.bf16.msra.mxu0 %v713_v6  ;;  %825 = vmatpush.bf16.msra.mxu1 %v713_v6 }
  0x41   : > { %826 = vmatpush.bf16.msra.mxu2 %v713_v6  ;;  %827 = vmatpush.bf16.msra.mxu3 %v713_v6  ;;  %v744_v6 = vunpack.c.h.bf16 %v797_v62 }
  0x44   : > { %420 = vmatpush.bf16.msra.mxu0 %v712_v7  ;;  %828 = vmatpush.bf16.msra.mxu1 %v712_v7 }
  0x45   : > { %829 = vmatpush.bf16.msra.mxu2 %v712_v7  ;;  %830 = vmatpush.bf16.msra.mxu3 %v712_v7  ;;  %v752_v7 = vunpack.c.h.bf16 %v799_v63 }
  0x47   : > { %421 = vmatmul.bf16.vlgmr.msra.gmra.mxu0 %v704_v8  ;;  %431 = vmatmul.bf16.vlgmr.msra.gmra.mxu1 %v706_v9 }
  0x48   : > { %441 = vmatmul.bf16.vlgmr.msra.gmra.mxu2 %v708_v10  ;;  %451 = vmatmul.bf16.vlgmr.msra.gmra.mxu3 %v710_v11 }
  0x57   : > { %426 = vmatmul.bf16.gmra.mxu0 %v705_v12  ;;  %436 = vmatmul.bf16.gmra.mxu1 %v707_v13 }
  0x58   : > { %446 = vmatmul.bf16.gmra.mxu2 %v709_v14  ;;  %456 = vmatmul.bf16.gmra.mxu3 %v711_v15 }
  0xc4   : > { %v422_v16 = vpop.f32.mrf.mxu0  ;;  %v432_v17 = vpop.f32.mrf.mxu1 }
  0xc5   : > { %v423_v28 = vadd.f32 %v723_v20, %v422_v16  ;;  %v433_v29 = vadd.f32 %v731_v21, %v432_v17 }
  0xcb   : > { %v442_v24 = vpop.f32.mrf.mxu2  ;;  %v452_v25 = vpop.f32.mrf.mxu3 }
  0xcc   : > { %v424_v26 = vpop.f32.mrf.mxu0  ;;  %v434_v27 = vpop.f32.mrf.mxu1  ;;  %v443_v42 = vadd.f32 %v739_v36, %v442_v24  ;;  %v453_v43 = vadd.f32 %v747_v37, %v452_v25 }
  0xcd   : > { %v425_v32 = vadd.f32 %v724_v22, %v424_v26  ;;  %v435_v33 = vadd.f32 %v732_v23, %v434_v27 }
  0xcf   : > { %v756_v34 = vpack.c.bf16 %v425_v32, %v423_v28  ;;  %v766_v35 = vpack.c.bf16 %v435_v33, %v433_v29 }
  0xd1   : > { %757 = vst [vmem:[%s1253_s20] sm:$0xff] %v756_v34  }
  0xd2   : > { %801 = vst [vmem:[%s1253_s20 + $0x10] sm:$0xff] %v766_v35  }
  0xd3   : > { %v444_v40 = vpop.f32.mrf.mxu2  ;;  %v454_v41 = vpop.f32.mrf.mxu3 }
  0xd4   : > { %v445_v44 = vadd.f32 %v740_v38, %v444_v40  ;;  %v455_v45 = vadd.f32 %v748_v39, %v454_v41  ;;  %v427_v46 = vpop.f32.mrf.mxu0  ;;  %v437_v47 = vpop.f32.mrf.mxu1 }
  0xd5   : > { %v428_v60 = vadd.f32 %v727_v52, %v427_v46  ;;  %v438_v61 = vadd.f32 %v735_v53, %v437_v47 }
  0xd6   : > { %v776_v48 = vpack.c.bf16 %v445_v44, %v443_v42  ;;  %v786_v49 = vpack.c.bf16 %v455_v45, %v453_v43 }
  0xd8   : > { %803 = vst [vmem:[%s1253_s20 + $0x20] sm:$0xff] %v776_v48  }
  0xd9   : > { %805 = vst [vmem:[%s1253_s20 + $0x30] sm:$0xff] %v786_v49  }
  0xdb   : > { %v447_v56 = vpop.f32.mrf.mxu2  ;;  %v457_v57 = vpop.f32.mrf.mxu3 }
  0xdc   : > { %v429_v58 = vpop.f32.mrf.mxu0  ;;  %v439_v59 = vpop.f32.mrf.mxu1  ;;  %v448_v10 = vadd.f32 %v743_v4, %v447_v56  ;;  %v458_v11 = vadd.f32 %v751_v5, %v457_v57 }
  0xdd   : > { %v430_v0 = vadd.f32 %v728_v54, %v429_v58  ;;  %v440_v1 = vadd.f32 %v736_v55, %v439_v59 }
  0xdf   : > { %v761_v2 = vpack.c.bf16 %v430_v0, %v428_v60  ;;  %v771_v3 = vpack.c.bf16 %v440_v1, %v438_v61 }
  0xe1   : > { %800 = vst [vmem:[%s1253_s20 + $0x8] sm:$0xff] %v761_v2  }
  0xe2   : > { %802 = vst [vmem:[%s1253_s20 + $0x18] sm:$0xff] %v771_v3  }
  0xe3   : > { %v449_v8 = vpop.f32.mrf.mxu2  ;;  %v459_v9 = vpop.f32.mrf.mxu3 }
  0xe4   : > { %v450_v12 = vadd.f32 %v744_v6, %v449_v8  ;;  %v460_v13 = vadd.f32 %v752_v7, %v459_v9 }
  0xe6   : > { %v781_v14 = vpack.c.bf16 %v450_v12, %v448_v10  ;;  %v791_v15 = vpack.c.bf16 %v460_v13, %v458_v11 }
  0xe8   : > { %804 = vst [vmem:[%s1253_s20 + $0x28] sm:$0xff] %v781_v14  }
  0xe9   : > { %806 = vst [vmem:[%s1253_s20 + $0x38] sm:$0xff] %v791_v15  }
  0xea   : > { %1035 = shalt.err (!%p1032_p0)
}
  0xeb   : > { %s1100_s10 = smov 64   ;;  %s1101_s24 = smov 4  }
  0xec   : > { %841 = dma.vmem_to_hbm [thread:$0]  (%p1204_p2), %s510_s23, 1024, %s512_s27, %s495_s15, %s1100_s10, %s1100_s10, %s1101_s24  }
  0xed PF: > { %s526_s18 = sand.u32 1, %s1074_s12   ;;  %p855_p4 = pnand %p625_p10, %p1169_p5 }
  0xee   : > { %s527_s20 = scalar_lea.sflag [#allocation4], %s526_s18 }
  0xef   : > { %p856_p6 = pneg %p855_p4 }
  0xf1   : > { %1069 = dma.done.wait (%p856_p6), %s527_s20, 1024  }
  0xf2   : > { %1071 = vsyncadd (%p856_p6), %s527_s20, 4294966272  ;;  %s20_s17 = sadd.s32 1, %s1094_s17   ;;  %s1311_s12 = smov %s1078_s13 }
  0xf3   : > { %p17_p8 = scmp.ge.s32.totalorder %s20_s17, 4   ;;  %s1312_s13 = smov %s1082_s14 }
  0xf4   : > { %s1313_s14 = smov %s1214_s25  ;;  %s1314_s15 = smov %s1090_s16 }
  0xf5   : > { %s1315_s16 = smov %s1317_s9  ;;  %19 = sbr.rel (!%p17_p8) target bundleno = 7 (0x7), region = 86 }
  0xfa   :  { %533 = vsyncpa [#allocation3], 1 }
  0xfb   :  { %535 = vsyncpa [#allocation3 + $0x1], 1 }
  0xfc   :  { %536 = vsyncpa [#allocation6], 1 }
  0xfd   :  { %537 = vsyncpa [#allocation4], 1 }
  0xfe   :  { %539 = vsyncpa [#allocation4 + $0x1], 1 }

</bundles_post_ra>
